<compile_context>
chip_gen: v5e
topology: v5e:2x2
jax: 0.10.0
libtpu: 0.0.40
codegen_flags: <defaults>
</compile_context>

<pallas_src>
import functools

import jax
import jax.numpy as jnp
from jax.experimental import pallas as pl
from jax.experimental.pallas import tpu as pltpu

_LANE = 128          # vreg lane width  (last dim)
_SUBLANE = 8         # vreg sublane width (second-to-last dim)
_MAX_BATCH_TILE = 256


def _round_up(n, m):
    return ((n + m - 1) // m) * m


def _fused_mlp_kernel(x_ref, *refs, n_layers):
    """Fused MLP: y_i = act(x_{i-1} @ W_i + b_i); activations stay on-chip.

    refs = (w0, b0, w1, b1, ..., w_out, b_out, o_ref); every array is a full
    (padded) block resident in VMEM.  Hidden layers use leaky_relu(0.01), the
    final layer uses tanh.  The Python loop unrolls at trace time.
    """
    o_ref = refs[-1]
    params = refs[:-1]
    x = x_ref[...]
    for i in range(n_layers):
        w = params[2 * i][...]
        b = params[2 * i + 1][...]            # (1, Dout_pad) broadcasts over batch
        y = jnp.dot(x, w, preferred_element_type=jnp.float32) + b
        if i < n_layers - 1:
            x = jnp.where(y > 0, y, jnp.float32(0.01) * y)   # leaky_relu
        else:
            x = jnp.tanh(y)                                   # output squashing
    o_ref[...] = x.astype(o_ref.dtype)


def init_actor_params(key, state_size, action_size, hidden_layers):
    """Parameter init mirroring Actor.reset_parameters():
       - hidden layers: xavier_normal weights, zero bias
       - output layer : weights ~ U(-0.003, 0.003), zero bias
    Weights are stored transposed as (in, out), zero-padded to multiples of
    128 on both dims; biases are stored as (1, out_pad)."""
    sizes = [state_size] + list(hidden_layers) + [action_size]
    n_layers = len(sizes) - 1
    params = []
    for li, (fan_in, fan_out) in enumerate(zip(sizes[:-1], sizes[1:])):
        key, wk = jax.random.split(key)
        if li < n_layers - 1:
            std = (2.0 / (fan_in + fan_out)) ** 0.5           # xavier normal, gain=1
            w = std * jax.random.normal(wk, (fan_in, fan_out), dtype=jnp.float32)
        else:
            w = jax.random.uniform(wk, (fan_in, fan_out),
                                   minval=-0.003, maxval=0.003, dtype=jnp.float32)
        in_pad = _round_up(fan_in, _LANE)
        out_pad = _round_up(fan_out, _LANE)
        w_pad = jnp.zeros((in_pad, out_pad), jnp.float32).at[:fan_in, :fan_out].set(w)
        b_pad = jnp.zeros((1, out_pad), jnp.float32)          # biases init to zero
        params.append((w_pad, b_pad))
    return params


def actor_forward(state, padded_params, action_size):
    """Full Actor forward pass as one fused Pallas kernel."""
    B, Din = state.shape
    n_layers = len(padded_params)
    din_pad = padded_params[0][0].shape[0]
    dout_pad = padded_params[-1][0].shape[1]

    # Pad batch to a sublane multiple; tile it only when it is large.
    b_pad = _round_up(B, _SUBLANE)
    tb = min(b_pad, _MAX_BATCH_TILE)
    b_pad = _round_up(b_pad, tb)
    num_tiles = b_pad // tb

    x = jnp.zeros((b_pad, din_pad), jnp.float32).at[:B, :Din].set(
        state.astype(jnp.float32))

    flat_params = []
    for w, b in padded_params:
        flat_params += [w, b]

    kernel = functools.partial(_fused_mlp_kernel, n_layers=n_layers)
    out_shape = jax.ShapeDtypeStruct((b_pad, dout_pad), jnp.float32)

    if num_tiles == 1:
        # Grid-less call: everything is one full-extent VMEM block.
        vmem = pl.BlockSpec(memory_space=pltpu.MemorySpace.VMEM)
        out = pl.pallas_call(
            kernel,
            out_shape=out_shape,
            in_specs=[vmem] * (1 + len(flat_params)),
            out_specs=vmem,
        )(x, *flat_params)
    else:
        # Batch-tiled: x/out tiled over batch; weights block-constant so they
        # stay resident in VMEM across grid steps.
        in_specs = [pl.BlockSpec((tb, din_pad), lambda i: (i, 0))]
        for w, b in padded_params:
            in_specs.append(pl.BlockSpec(w.shape, lambda i: (0, 0)))
            in_specs.append(pl.BlockSpec(b.shape, lambda i: (0, 0)))
        out = pl.pallas_call(
            kernel,
            out_shape=out_shape,
            grid=(num_tiles,),
            in_specs=in_specs,
            out_specs=pl.BlockSpec((tb, dout_pad), lambda i: (i, 0)),
            compiler_params=pltpu.CompilerParams(
                dimension_semantics=("parallel",)),   # v7x: 2 TCs split the batch
        )(x, *flat_params)

    # Slice padded tanh(0)=0 columns / padded batch rows back out.
    return out[:B, :action_size]


def _actor_forward_ref(state, padded_params, action_size):
    """Pure-JAX reference on the same padded params (correctness check)."""
    din_pad = padded_params[0][0].shape[0]
    x = jnp.zeros((state.shape[0], din_pad), jnp.float32).at[
        :, :state.shape[1]].set(state.astype(jnp.float32))
    n = len(padded_params)
    for i, (w, b) in enumerate(padded_params):
        y = x @ w + b
        x = jnp.where(y > 0, y, 0.01 * y) if i < n - 1 else jnp.tanh(y)
    return x[:, :action_size]


if __name__ == "__main__":
    # Small shapes consistent with the module: state -> hidden MLP -> action.
    batch = 2
    state_size = 16
    action_size = 4
    hidden_layers = [32, 32]

    key = jax.random.PRNGKey(0)
    key, pkey, xkey = jax.random.split(key, 3)

    params = init_actor_params(pkey, state_size, action_size, hidden_layers)
    state = jax.random.normal(xkey, (batch, state_size), dtype=jnp.float32)

    actions = actor_forward(state, params, action_size)
    actions = jax.block_until_ready(actions)

    ref = _actor_forward_ref(state, params, action_size)

    assert actions.shape == (batch, action_size)
    assert bool(jnp.all(jnp.abs(actions) <= 1.0))           # tanh range check
    assert bool(jnp.allclose(actions, ref, rtol=1e-2, atol=1e-2))
    print("KERNEL_OK")
</pallas_src>

<mosaic_0001>
module attributes {stable_mosaic.version = 11 : i64} {
  func.func @_fused_mlp_kernel(%arg0: memref<8x128xf32, #tpu.memory_space<vmem>>, %arg1: memref<128x128xf32, #tpu.memory_space<vmem>>, %arg2: memref<1x128xf32, #tpu.memory_space<vmem>>, %arg3: memref<128x128xf32, #tpu.memory_space<vmem>>, %arg4: memref<1x128xf32, #tpu.memory_space<vmem>>, %arg5: memref<128x128xf32, #tpu.memory_space<vmem>>, %arg6: memref<1x128xf32, #tpu.memory_space<vmem>>, %arg7: memref<8x128xf32, #tpu.memory_space<vmem>>) attributes {dimension_semantics = [], scalar_prefetch = 0 : i64, scratch_operands = 0 : i64, tpu.core_type = #tpu.core_type<tc>} {
    %c0 = arith.constant 0 : index
    %c0_0 = arith.constant 0 : index
    %0 = vector.load %arg0[%c0, %c0_0] : memref<8x128xf32, #tpu.memory_space<vmem>>, vector<8x128xf32>
    %c0_1 = arith.constant 0 : index
    %c0_2 = arith.constant 0 : index
    %1 = vector.load %arg1[%c0_1, %c0_2] : memref<128x128xf32, #tpu.memory_space<vmem>>, vector<128x128xf32>
    %c0_3 = arith.constant 0 : index
    %c0_4 = arith.constant 0 : index
    %2 = vector.load %arg2[%c0_3, %c0_4] : memref<1x128xf32, #tpu.memory_space<vmem>>, vector<1x128xf32>
    %cst = arith.constant dense<0.000000e+00> : vector<8x128xf32>
    %3 = tpu.matmul %0, %1, %cst {dimension_numbers = #tpu.dot_dimension_numbers<[1], [0], [0], [1], [0, 0, 1, 1], [], []>} : vector<8x128xf32>, vector<128x128xf32>, vector<8x128xf32> -> vector<8x128xf32>
    %4 = vector.broadcast %2 : vector<1x128xf32> to vector<8x128xf32>
    %5 = arith.addf %3, %4 : vector<8x128xf32>
    %cst_5 = arith.constant 0.000000e+00 : f32
    %6 = vector.broadcast %cst_5 : f32 to vector<8x128xf32>
    %7 = arith.cmpf ogt, %5, %6 : vector<8x128xf32>
    %cst_6 = arith.constant 0.00999999977 : f32
    %8 = vector.broadcast %cst_6 : f32 to vector<8x128xf32>
    %9 = arith.mulf %8, %5 : vector<8x128xf32>
    %10 = arith.select %7, %5, %9 : vector<8x128xi1>, vector<8x128xf32>
    %c0_7 = arith.constant 0 : index
    %c0_8 = arith.constant 0 : index
    %11 = vector.load %arg3[%c0_7, %c0_8] : memref<128x128xf32, #tpu.memory_space<vmem>>, vector<128x128xf32>
    %c0_9 = arith.constant 0 : index
    %c0_10 = arith.constant 0 : index
    %12 = vector.load %arg4[%c0_9, %c0_10] : memref<1x128xf32, #tpu.memory_space<vmem>>, vector<1x128xf32>
    %cst_11 = arith.constant dense<0.000000e+00> : vector<8x128xf32>
    %13 = tpu.matmul %10, %11, %cst_11 {dimension_numbers = #tpu.dot_dimension_numbers<[1], [0], [0], [1], [0, 0, 1, 1], [], []>} : vector<8x128xf32>, vector<128x128xf32>, vector<8x128xf32> -> vector<8x128xf32>
    %14 = vector.broadcast %12 : vector<1x128xf32> to vector<8x128xf32>
    %15 = arith.addf %13, %14 : vector<8x128xf32>
    %cst_12 = arith.constant 0.000000e+00 : f32
    %16 = vector.broadcast %cst_12 : f32 to vector<8x128xf32>
    %17 = arith.cmpf ogt, %15, %16 : vector<8x128xf32>
    %cst_13 = arith.constant 0.00999999977 : f32
    %18 = vector.broadcast %cst_13 : f32 to vector<8x128xf32>
    %19 = arith.mulf %18, %15 : vector<8x128xf32>
    %20 = arith.select %17, %15, %19 : vector<8x128xi1>, vector<8x128xf32>
    %c0_14 = arith.constant 0 : index
    %c0_15 = arith.constant 0 : index
    %21 = vector.load %arg5[%c0_14, %c0_15] : memref<128x128xf32, #tpu.memory_space<vmem>>, vector<128x128xf32>
    %c0_16 = arith.constant 0 : index
    %c0_17 = arith.constant 0 : index
    %22 = vector.load %arg6[%c0_16, %c0_17] : memref<1x128xf32, #tpu.memory_space<vmem>>, vector<1x128xf32>
    %cst_18 = arith.constant dense<0.000000e+00> : vector<8x128xf32>
    %23 = tpu.matmul %20, %21, %cst_18 {dimension_numbers = #tpu.dot_dimension_numbers<[1], [0], [0], [1], [0, 0, 1, 1], [], []>} : vector<8x128xf32>, vector<128x128xf32>, vector<8x128xf32> -> vector<8x128xf32>
    %24 = vector.broadcast %22 : vector<1x128xf32> to vector<8x128xf32>
    %25 = arith.addf %23, %24 : vector<8x128xf32>
    %26 = math.tanh %25 : vector<8x128xf32>
    %c0_19 = arith.constant 0 : index
    %c0_20 = arith.constant 0 : index
    %27 = vector.load %arg7[%c0_19, %c0_20] : memref<8x128xf32, #tpu.memory_space<vmem>>, vector<8x128xf32>
    tpu.vector_store %arg7[%c0_19, %c0_20], %26 {strides = array<i32>} : memref<8x128xf32, #tpu.memory_space<vmem>>, vector<8x128xf32>,
    return
  }
}

</mosaic_0001>

<bundles_post_ra>
// kernel: tpu_custom_call.1
= control target key start
LH: loop header
LB: loop body
LE: loop exit
PB: predicated region body
PF: predicated region fallthrough
CT: control target
= control target key end

     0   :  { %12 = vsyncpa [#allocation3], 0  ;;  %s447_s0 = inlined_call_operand.hbm [shape: f32[8,128], index: 0, kind: input, shape index: {}]   ;;  %s448_s1 = inlined_call_operand.hbm [shape: f32[128,128], index: 1, kind: input, shape index: {}]   ;;  %s449_s2 = inlined_call_operand.vmem [shape: f32[1,128], index: 2, kind: input, shape index: {}]   ;;  %s450_s3 = inlined_call_operand.hbm [shape: f32[128,128], index: 3, kind: input, shape index: {}]   ;;  %s451_s4 = inlined_call_operand.vmem [shape: f32[1,128], index: 4, kind: input, shape index: {}]   ;;  %s452_s5 = inlined_call_operand.hbm [shape: f32[128,128], index: 5, kind: input, shape index: {}]   ;;  %s453_s6 = inlined_call_operand.vmem [shape: f32[1,128], index: 6, kind: input, shape index: {}]   ;;  %s454_s7 = inlined_call_operand.hbm [shape: f32[8,128], index: 7, kind: output, shape index: {}]  }
   0x1   :  { %13 = vsyncpa [#allocation6], 0 }
   0x2   :  { %14 = vsyncpa [#allocation9], 0  ;;  %s31_s26 = sshll.u32 %s448_s1, 4  ;;  %s32_s26 = int_to_ptr.hbm [resolvable:$true] %s31_s26 }
   0x3   :  { %15 = vsyncpa [#allocation4], 0  ;;  %s376_s27 = smov [#allocation5]   ;;  %s21_s8 = sshll.u32 %s447_s0, 4  ;;  %s22_s8 = int_to_ptr.hbm [resolvable:$true] %s21_s8 }
   0x4   :  { %s33_s28 = sshll.u32 %s376_s27, 4  ;;  %s377_s9 = smov 128   ;;  %s34_s28 = int_to_ptr.vmem [resolvable:$true] %s33_s28 }
   0x5   :  { %s378_s10 = smov 8   ;;  %s379_s11 = smov [#allocation2]  }
   0x6   :  { %39 = dma.hbm_to_vmem [thread:$0]  %s32_s26, 2048, %s34_s28, [#allocation6], %s377_s9, %s377_s9, %s378_s10  }
   0x7   :  { %s23_s12 = sshll.u32 %s379_s11, 4  ;;  %s46_s15 = sshll.u32 %s450_s3, 4  ;;  %s24_s12 = int_to_ptr.vmem [resolvable:$true] %s23_s12  ;;  %s47_s15 = int_to_ptr.hbm [resolvable:$true] %s46_s15 }
   0x8   :  { %26 = dma.hbm_to_vmem [thread:$0]  %s22_s8, 128, %s24_s12, [#allocation3]  }
   0x9   :  { %s61_s17 = sshll.u32 %s452_s5, 4  ;;  %s380_s18 = smov [#allocation7]   ;;  %s62_s17 = int_to_ptr.hbm [resolvable:$true] %s61_s17 }
   0xa   :  { %s48_s19 = sshll.u32 %s380_s18, 4  ;;  %s381_s0 = smov [#allocation8]   ;;  %s49_s19 = int_to_ptr.vmem [resolvable:$true] %s48_s19 }
   0xb   :  { %54 = dma.hbm_to_vmem [thread:$0]  %s47_s15, 2048, %s49_s19, [#allocation6], %s377_s9, %s377_s9, %s378_s10  }
   0xc   :  { %s63_s20 = sshll.u32 %s381_s0, 4  ;;  %s64_s20 = int_to_ptr.vmem [resolvable:$true] %s63_s20 }
   0xd   :  { %69 = dma.hbm_to_vmem [thread:$0]  %s62_s17, 2048, %s64_s20, [#allocation9], %s377_s9, %s377_s9, %s378_s10  }
   0xe   :  { %368 = dma.done.wait [#allocation3], 128  }
   0xf   :  { %369 = vsyncadd [#allocation3], 4294967168 }
  0x10   :  { %370 = dma.done.wait [#allocation6], 4096  }
  0x11   :  { %371 = vsyncadd [#allocation6], 4294963200 }
  0x12   :  { %372 = dma.done.wait [#allocation9], 2048  }
  0x13   :  { %373 = vsyncadd [#allocation9], 4294965248  ;;  %v104_v0 = vld [vmem:[#allocation5 + $0x78] sm:$0xff]  ;;  %v103_v1 = vld [vmem:[#allocation5 + $0x70] sm:$0xff]  ;;  %s382_s24 = smov [#allocation10]   ;;  %s224_s28 = sshll.u32 %s454_s7, 4  ;;  %s225_s28 = int_to_ptr.hbm [resolvable:$true] %s224_s28 }
  0x14   :  { %109 = vmatpush.msra.mxu0 %v104_v0  ;;  %v102_v2 = vld [vmem:[#allocation5 + $0x68] sm:$0xff]  ;;  %v101_v3 = vld [vmem:[#allocation5 + $0x60] sm:$0xff]  ;;  %v147_v4 = vld [vmem:[#allocation7 + $0x78] sm:$0xff]  ;;  %s222_s25 = sshll.u32 %s382_s24, 4  ;;  %s223_s25 = int_to_ptr.vmem [resolvable:$true] %s222_s25 }
  0x15   :  { %v100_v5 = vld [vmem:[#allocation5 + $0x58] sm:$0xff]  ;;  %152 = vmatpush.msra.mxu1 %v147_v4  ;;  %v146_v6 = vld [vmem:[#allocation7 + $0x70] sm:$0xff]  ;;  %v145_v7 = vld [vmem:[#allocation7 + $0x68] sm:$0xff] }
  0x16   :  { %110 = vmatpush.msra.mxu0 %v103_v1  ;;  %v99_v8 = vld [vmem:[#allocation5 + $0x50] sm:$0xff]  ;;  %v144_v9 = vld [vmem:[#allocation7 + $0x60] sm:$0xff]  ;;  %v98_v10 = vld [vmem:[#allocation5 + $0x48] sm:$0xff] }
  0x17   :  { %153 = vmatpush.msra.mxu1 %v146_v6  ;;  %v143_v11 = vld [vmem:[#allocation7 + $0x58] sm:$0xff]  ;;  %v97_v12 = vld [vmem:[#allocation5 + $0x40] sm:$0xff]  ;;  %v142_v13 = vld [vmem:[#allocation7 + $0x50] sm:$0xff] }
  0x18   :  { %111 = vmatpush.msra.mxu0 %v102_v2  ;;  %v96_v14 = vld [vmem:[#allocation5 + $0x38] sm:$0xff]  ;;  %v141_v15 = vld [vmem:[#allocation7 + $0x48] sm:$0xff]  ;;  %v95_v16 = vld [vmem:[#allocation5 + $0x30] sm:$0xff] }
  0x19   :  { %154 = vmatpush.msra.mxu1 %v145_v7  ;;  %v140_v17 = vld [vmem:[#allocation7 + $0x40] sm:$0xff]  ;;  %v94_v18 = vld [vmem:[#allocation5 + $0x28] sm:$0xff]  ;;  %v139_v19 = vld [vmem:[#allocation7 + $0x38] sm:$0xff] }
  0x1a   :  { %112 = vmatpush.msra.mxu0 %v101_v3  ;;  %v93_v20 = vld [vmem:[#allocation5 + $0x20] sm:$0xff]  ;;  %v138_v21 = vld [vmem:[#allocation7 + $0x30] sm:$0xff]  ;;  %v92_v22 = vld [vmem:[#allocation5 + $0x18] sm:$0xff] }
  0x1b   :  { %155 = vmatpush.msra.mxu1 %v144_v9  ;;  %v137_v23 = vld [vmem:[#allocation7 + $0x28] sm:$0xff]  ;;  %v91_v24 = vld [vmem:[#allocation5 + $0x10] sm:$0xff]  ;;  %v136_v25 = vld [vmem:[#allocation7 + $0x20] sm:$0xff] }
  0x1c   :  { %113 = vmatpush.msra.mxu0 %v100_v5  ;;  %v90_v26 = vld [vmem:[#allocation5 + $0x8] sm:$0xff]  ;;  %v135_v27 = vld [vmem:[#allocation7 + $0x18] sm:$0xff]  ;;  %v89_v28 = vld [vmem:[#allocation5] sm:$0xff] }
  0x1d   :  { %156 = vmatpush.msra.mxu1 %v143_v11  ;;  %v88_v29 = vld [vmem:[#allocation2] sm:$0xff]  ;;  %v134_v30 = vld [vmem:[#allocation7 + $0x10] sm:$0xff]  ;;  %v133_v31 = vld [vmem:[#allocation7 + $0x8] sm:$0xff] }
  0x1e   :  { %114 = vmatpush.msra.mxu0 %v99_v8  ;;  %v132_v32 = vld [vmem:[#allocation7] sm:$0xff]  ;;  %v190_v33 = vld [vmem:[#allocation8 + $0x78] sm:$0xff]  ;;  %v189_v34 = vld [vmem:[#allocation8 + $0x70] sm:$0xff] }
  0x1f   :  { %157 = vmatpush.msra.mxu1 %v142_v13  ;;  %195 = vmatpush.msra.mxu2 %v190_v33  ;;  %v188_v35 = vld [vmem:[#allocation8 + $0x68] sm:$0xff]  ;;  %v187_v36 = vld [vmem:[#allocation8 + $0x60] sm:$0xff]  ;;  %v186_v37 = vld [vmem:[#allocation8 + $0x58] sm:$0xff] }
  0x20   :  { %115 = vmatpush.msra.mxu0 %v98_v10  ;;  %v185_v38 = vld [vmem:[#allocation8 + $0x50] sm:$0xff]  ;;  %v184_v39 = vld [vmem:[#allocation8 + $0x48] sm:$0xff]  ;;  %v183_v40 = vld [vmem:[#allocation8 + $0x40] sm:$0xff] }
  0x21   :  { %158 = vmatpush.msra.mxu1 %v141_v15  ;;  %196 = vmatpush.msra.mxu2 %v189_v34  ;;  %v182_v41 = vld [vmem:[#allocation8 + $0x38] sm:$0xff]  ;;  %v181_v42 = vld [vmem:[#allocation8 + $0x30] sm:$0xff]  ;;  %v180_v43 = vld [vmem:[#allocation8 + $0x28] sm:$0xff] }
  0x22   :  { %116 = vmatpush.msra.mxu0 %v97_v12  ;;  %v179_v44 = vld [vmem:[#allocation8 + $0x20] sm:$0xff]  ;;  %v178_v45 = vld [vmem:[#allocation8 + $0x18] sm:$0xff]  ;;  %v177_v51 = vld [vmem:[#allocation8 + $0x10] sm:$0xff] }
  0x23   :  { %159 = vmatpush.msra.mxu1 %v140_v17  ;;  %197 = vmatpush.msra.mxu2 %v188_v35  ;;  %v243_v46 = vld [vmem:[%s449_s2] ss:$0 sm:$0xff]  ;;  %v176_v52 = vld [vmem:[#allocation8 + $0x8] sm:$0xff]  ;;  %v175_v53 = vld [vmem:[#allocation8] sm:$0xff] }
  0x24   :  { %117 = vmatpush.msra.mxu0 %v96_v14  ;;  %v244_v54 = vld [vmem:[%s451_s4] ss:$0 sm:$0xff] }
  0x25   :  { %160 = vmatpush.msra.mxu1 %v139_v19  ;;  %198 = vmatpush.msra.mxu2 %v187_v36  ;;  %v245_v59 = vld [vmem:[%s453_s6] ss:$0 sm:$0xff] }
  0x26   :  { %118 = vmatpush.msra.mxu0 %v95_v16 }
  0x27   :  { %161 = vmatpush.msra.mxu1 %v138_v21  ;;  %199 = vmatpush.msra.mxu2 %v186_v37 }
  0x28   :  { %119 = vmatpush.msra.mxu0 %v94_v18 }
  0x29   :  { %162 = vmatpush.msra.mxu1 %v137_v23  ;;  %200 = vmatpush.msra.mxu2 %v185_v38 }
  0x2a   :  { %120 = vmatpush.msra.mxu0 %v93_v20 }
  0x2b   :  { %163 = vmatpush.msra.mxu1 %v136_v25  ;;  %201 = vmatpush.msra.mxu2 %v184_v39 }
  0x2c   :  { %121 = vmatpush.msra.mxu0 %v92_v22 }
  0x2d   :  { %164 = vmatpush.msra.mxu1 %v135_v27  ;;  %202 = vmatpush.msra.mxu2 %v183_v40 }
  0x2e   :  { %122 = vmatpush.msra.mxu0 %v91_v24 }
  0x2f   :  { %165 = vmatpush.msra.mxu1 %v134_v30  ;;  %203 = vmatpush.msra.mxu2 %v182_v41 }
  0x30   :  { %123 = vmatpush.msra.mxu0 %v90_v26 }
  0x31   :  { %166 = vmatpush.msra.mxu1 %v133_v31  ;;  %204 = vmatpush.msra.mxu2 %v181_v42 }
  0x32   :  { %124 = vmatpush.msra.mxu0 %v89_v28 }
  0x33   :  { %125 = vmatmul.f32.vlgmr.msra.gmra.mxu0 %v88_v29  ;;  %167 = vmatpush.msra.mxu1 %v132_v32 }
  0x34   :  { %205 = vmatpush.msra.mxu2 %v180_v43 }
  0x36   :  { %206 = vmatpush.msra.mxu2 %v179_v44 }
  0x38   :  { %207 = vmatpush.msra.mxu2 %v178_v45 }
  0x3a   :  { %208 = vmatpush.msra.mxu2 %v177_v51 }
  0x3c   :  { %209 = vmatpush.msra.mxu2 %v176_v52 }
  0x3e   :  { %210 = vmatpush.msra.mxu2 %v175_v53 }
  0xb0   :  { %v126_v47 = vpop.f32.mrf.mxu0 }
  0xb1   :  { %v127_v48 = vadd.f32 %v243_v46, %v126_v47 }
  0xb3   :  { %vm129_vm0 = vcmp.gt.f32.partialorder %v127_v48, 0.0  ;;  %v130_v49 = vmul.f32 0.01, %v127_v48 }
  0xb5   :  { %v131_v50 = vsel %vm129_vm0, %v127_v48, %v130_v49 }
  0xb6   :  { %168 = vmatmul.f32.vlgmr.msra.gmra.mxu1 %v131_v50 }
 0x133   :  { %v169_v55 = vpop.f32.mrf.mxu1 }
 0x134   :  { %v170_v56 = vadd.f32 %v244_v54, %v169_v55 }
 0x136   :  { %vm172_vm1 = vcmp.gt.f32.partialorder %v170_v56, 0.0  ;;  %v173_v57 = vmul.f32 0.01, %v170_v56 }
 0x138   :  { %v174_v58 = vsel %vm172_vm1, %v170_v56, %v173_v57 }
 0x139   :  { %211 = vmatmul.f32.vlgmr.msra.gmra.mxu2 %v174_v58 }
 0x1bc   :  { %v212_v60 = vpop.f32.mrf.mxu2 }
 0x1bd   :  { %v213_v61 = vadd.f32 %v245_v59, %v212_v60 }
 0x1bf   :  { %246 = vtanh.f32 %v213_v61 }
 0x1c5   :  { %v247_v62 = vpop.eup %246 }
 0x1c6   :  { %216 = vst [vmem:[#allocation10] sm:$0xff] %v247_v62 }
 0x1c7   :  { %227 = dma.vmem_to_hbm [thread:$0]  %s223_s25, 128, %s225_s28, [#allocation4]  }
 0x1c8   :  { %374 = dma.done.wait [#allocation4], 128  }
 0x1c9   :  { %375 = vsyncadd [#allocation4], 4294967168 }
 0x1ca   :  { %232 = vsyncpa [#allocation3], 1 }
 0x1cb   :  { %233 = vsyncpa [#allocation6], 1 }
 0x1cc   :  { %234 = vsyncpa [#allocation9], 1 }
 0x1cd   :  { %235 = vsyncpa [#allocation4], 1 }

</bundles_post_ra>
